<compile_context>
chip_gen: v7x
topology: tpu7x:2x2x1
jax: 0.10.0
libtpu: 0.0.40
codegen_flags: <defaults>
</compile_context>

<pallas_src>
import numpy as np
import jax
import jax.numpy as jnp
from jax.experimental import pallas as pl
from jax.experimental.pallas import tpu as pltpu

LANE = 128
SUBLANE_BF16 = 16   # bf16 packs 2 rows/sublane -> pad obs_dim to 16, not 128


def _round_up(x, m):
    return (x + m - 1) // m * m


# ---------------------------------------------------------------------------
# Pallas kernel: fused 3-layer MLP (Linear+ReLU) + fused actor/critic heads.
# One grid step processes one batch tile; all weights are VMEM-resident.
# ---------------------------------------------------------------------------
def actor_critic_kernel(x_ref,
                        w1_ref, b1_ref,
                        w2_ref, b2_ref,
                        w3_ref, b3_ref,
                        wh_ref, bh_ref,
                        out_ref):
    cdt = w1_ref.dtype                       # MXU input dtype (bf16)
    x = x_ref[...].astype(cdt)               # [TILE_B, obs_pad(=16)]

    # Each layer: bf16 MXU dot with f32 accumulation, f32 bias-add + ReLU,
    # immediate bf16 downcast so only the bf16 activation stays live.
    h = jnp.maximum(jnp.dot(x, w1_ref[...], preferred_element_type=jnp.float32)
                    + b1_ref[...], 0.0).astype(cdt)
    h = jnp.maximum(jnp.dot(h, w2_ref[...], preferred_element_type=jnp.float32)
                    + b2_ref[...], 0.0).astype(cdt)
    h = jnp.maximum(jnp.dot(h, w3_ref[...], preferred_element_type=jnp.float32)
                    + b3_ref[...], 0.0).astype(cdt)

    # Fused actor heads + critic head, lane-padded to 128: [TILE_B, head_pad].
    out_ref[...] = (jnp.dot(h, wh_ref[...], preferred_element_type=jnp.float32)
                    + bh_ref[...])
    # TODO(synk): get_action_and_value's softmax / log_prob / entropy could be
    # fused here as an epilogue (exp/log land on the otherwise-idle EUP slot);
    # left out to preserve forward() semantics (raw logits + value).


# ---------------------------------------------------------------------------
# Wrapper: pad batch / lanes, run the tiled pallas_call, split outputs like
# the PyTorch module (list of per-head logits + value column).
# ---------------------------------------------------------------------------
def actor_critic_forward(obs, params, action_dims, *,
                         tile_b=None, vmem_limit_bytes=32 * 1024 * 1024):
    B, obs_dim = obs.shape
    obs_pad = params["w1"].shape[0]
    hidden = params["w1"].shape[1]
    head_pad = params["wh"].shape[1]

    if tile_b is None:
        # Small batches: single grid step (avoids ~0.35 us/step serial loop on
        # v5e/v6e and better amortizes MXU fill/drain).  Large batches: 512-row
        # tiles, batch axis "parallel" for v7x megacore sharding.
        tile_b = _round_up(max(B, 1), LANE) if B <= 512 else 512
    Bp = _round_up(max(B, 1), tile_b)

    # Pad batch to a multiple of tile_b; pad obs only to the bf16 sublane pack
    # width (16), NOT 128 lanes.  w1 rows beyond obs_dim are zero, so the
    # zero-padded obs columns contribute nothing.
    x = jnp.zeros((Bp, obs_pad), jnp.float32).at[:B, :obs_dim].set(
        obs.astype(jnp.float32))

    const = lambda i: (0, 0)                # weights/biases resident across tiles
    out = pl.pallas_call(
        actor_critic_kernel,
        out_shape=jax.ShapeDtypeStruct((Bp, head_pad), jnp.float32),
        grid=(Bp // tile_b,),
        in_specs=[
            pl.BlockSpec((tile_b, obs_pad), lambda i: (i, 0)),   # obs tile
            pl.BlockSpec((obs_pad, hidden), const),              # w1 (16, hidden)
            pl.BlockSpec((1, hidden), const),                    # b1
            pl.BlockSpec((hidden, hidden), const),               # w2
            pl.BlockSpec((1, hidden), const),                    # b2
            pl.BlockSpec((hidden, hidden), const),               # w3
            pl.BlockSpec((1, hidden), const),                    # b3
            pl.BlockSpec((hidden, head_pad), const),             # wh (heads+critic)
            pl.BlockSpec((1, head_pad), const),                  # bh
        ],
        out_specs=pl.BlockSpec((tile_b, head_pad), lambda i: (i, 0)),
        compiler_params=pltpu.CompilerParams(
            dimension_semantics=("parallel",),
            vmem_limit_bytes=vmem_limit_bytes),
    )(x,
      params["w1"], params["b1"],
      params["w2"], params["b2"],
      params["w3"], params["b3"],
      params["wh"], params["bh"])

    out = out[:B]                           # drop batch padding
    action_logits, off = [], 0
    for d in action_dims:
        action_logits.append(out[:, off:off + d])
        off += d
    values = out[:, off:off + 1]            # [B, 1]
    return action_logits, values


# ---------------------------------------------------------------------------
# Deterministic parameter construction (orthogonal init, gain=sqrt(2), zero
# bias) mirroring ActorCriticNetwork._init_weights.  Weights are stored
# transposed vs. PyTorch, i.e. (in, out): w1 rows padded only to 16,
# fused heads padded to 128 lanes, bf16 for the MXU; biases stay f32.
# ---------------------------------------------------------------------------
def make_params(key, obs_dim, hidden, action_dims, *, compute_dtype=jnp.bfloat16):
    ortho = jax.nn.initializers.orthogonal(scale=float(np.sqrt(2.0)))
    ks = jax.random.split(key, 4 + len(action_dims))

    obs_pad = _round_up(obs_dim, SUBLANE_BF16)
    total_head = sum(action_dims) + 1
    head_pad = _round_up(total_head, LANE)

    w1 = ortho(ks[0], (obs_dim, hidden), jnp.float32)
    w1p = jnp.zeros((obs_pad, hidden), jnp.float32).at[:obs_dim].set(w1)
    w2 = ortho(ks[1], (hidden, hidden), jnp.float32)
    w3 = ortho(ks[2], (hidden, hidden), jnp.float32)

    head_ws = [ortho(ks[3 + i], (hidden, d), jnp.float32)
               for i, d in enumerate(action_dims)]
    critic_w = ortho(ks[3 + len(action_dims)], (hidden, 1), jnp.float32)
    wh = jnp.concatenate(head_ws + [critic_w], axis=1)            # (hidden, 14)
    whp = jnp.zeros((hidden, head_pad), jnp.float32).at[:, :total_head].set(wh)

    cd = compute_dtype
    return {
        "w1": w1p.astype(cd), "b1": jnp.zeros((1, hidden), jnp.float32),
        "w2": w2.astype(cd),  "b2": jnp.zeros((1, hidden), jnp.float32),
        "w3": w3.astype(cd),  "b3": jnp.zeros((1, hidden), jnp.float32),
        "wh": whp.astype(cd), "bh": jnp.zeros((1, head_pad), jnp.float32),
    }


def reference_forward(obs, params, action_dims):
    """Pure-JAX reference using the same compute path (bf16 dots, f32 acc)."""
    cd = params["w1"].dtype
    B, obs_dim = obs.shape
    x = jnp.zeros((B, params["w1"].shape[0]), jnp.float32).at[:, :obs_dim].set(obs)
    h = jnp.maximum(jnp.dot(x.astype(cd), params["w1"],
                            preferred_element_type=jnp.float32)
                    + params["b1"], 0.0).astype(cd)
    h = jnp.maximum(jnp.dot(h, params["w2"],
                            preferred_element_type=jnp.float32)
                    + params["b2"], 0.0).astype(cd)
    h = jnp.maximum(jnp.dot(h, params["w3"],
                            preferred_element_type=jnp.float32)
                    + params["b3"], 0.0).astype(cd)
    out = (jnp.dot(h, params["wh"], preferred_element_type=jnp.float32)
           + params["bh"])
    logits, off = [], 0
    for d in action_dims:
        logits.append(out[:, off:off + d]); off += d
    return logits, out[:, off:off + 1]


if __name__ == "__main__":
    # Shapes consistent with PPOConfig defaults:
    #   observation_dim=10, hidden_size=256, action_dims=[5, 5, 3], critic -> 1
    #   batch_size=64  -> single 128-row batch tile (grid collapses to 1 step).
    B = 64
    OBS_DIM = 10
    HIDDEN = 256
    ACTION_DIMS = [5, 5, 3]

    key = jax.random.PRNGKey(0)
    k_obs, k_params = jax.random.split(key)
    obs = jax.random.normal(k_obs, (B, OBS_DIM), dtype=jnp.float32)
    params = make_params(k_params, OBS_DIM, HIDDEN, ACTION_DIMS)

    action_logits, values = actor_critic_forward(obs, params, ACTION_DIMS)
    jax.block_until_ready(values)

    # sanity check against pure-JAX reference (same bf16-dot / f32-acc path)
    ref_logits, ref_values = reference_forward(obs, params, ACTION_DIMS)
    for a, b in zip(action_logits, ref_logits):
        np.testing.assert_allclose(np.asarray(a), np.asarray(b),
                                   atol=1e-2, rtol=1e-2)
    np.testing.assert_allclose(np.asarray(values), np.asarray(ref_values),
                               atol=1e-2, rtol=1e-2)
    assert values.shape == (B, 1)
    assert [l.shape for l in action_logits] == [(B, d) for d in ACTION_DIMS]

    # TODO(synk): get_action_and_value (Categorical sampling / log_prob /
    # entropy) is plain-JAX glue around this forward and is not a kernel.
    print("KERNEL_OK")
</pallas_src>

<mosaic_0001>
module attributes {stable_mosaic.version = 11 : i64} {
  func.func @actor_critic_kernel(%arg0: i32, %arg1: memref<128x16xf32, #tpu.memory_space<vmem>>, %arg2: memref<16x256xbf16, #tpu.memory_space<vmem>>, %arg3: memref<1x256xf32, #tpu.memory_space<vmem>>, %arg4: memref<256x256xbf16, #tpu.memory_space<vmem>>, %arg5: memref<1x256xf32, #tpu.memory_space<vmem>>, %arg6: memref<256x256xbf16, #tpu.memory_space<vmem>>, %arg7: memref<1x256xf32, #tpu.memory_space<vmem>>, %arg8: memref<256x128xbf16, #tpu.memory_space<vmem>>, %arg9: memref<1x128xf32, #tpu.memory_space<vmem>>, %arg10: memref<128x128xf32, #tpu.memory_space<vmem>>) attributes {dimension_semantics = [#tpu.dimension_semantics<parallel>], iteration_bounds = array<i64: 1>, scalar_prefetch = 0 : i64, scratch_operands = 0 : i64, tpu.core_type = #tpu.core_type<tc>, window_params = [{transform_indices = @transform_0, window_bounds = array<i64: 128, 16>}, {pipeline_mode = #tpu.pipeline_mode<synchronous>, transform_indices = @transform_1, window_bounds = array<i64: 16, 256>}, {pipeline_mode = #tpu.pipeline_mode<synchronous>, transform_indices = @transform_2, window_bounds = array<i64: 1, 256>}, {pipeline_mode = #tpu.pipeline_mode<synchronous>, transform_indices = @transform_3, window_bounds = array<i64: 256, 256>}, {pipeline_mode = #tpu.pipeline_mode<synchronous>, transform_indices = @transform_4, window_bounds = array<i64: 1, 256>}, {pipeline_mode = #tpu.pipeline_mode<synchronous>, transform_indices = @transform_5, window_bounds = array<i64: 256, 256>}, {pipeline_mode = #tpu.pipeline_mode<synchronous>, transform_indices = @transform_6, window_bounds = array<i64: 1, 256>}, {pipeline_mode = #tpu.pipeline_mode<synchronous>, transform_indices = @transform_7, window_bounds = array<i64: 256, 128>}, {pipeline_mode = #tpu.pipeline_mode<synchronous>, transform_indices = @transform_8, window_bounds = array<i64: 1, 128>}, {transform_indices = @transform_9, window_bounds = array<i64: 128, 128>}]} {
    %c0 = arith.constant 0 : index
    %c0_0 = arith.constant 0 : index
    %0 = vector.load %arg1[%c0, %c0_0] : memref<128x16xf32, #tpu.memory_space<vmem>>, vector<128x16xf32>
    %1 = arith.truncf %0 : vector<128x16xf32> to vector<128x16xbf16>
    %c0_1 = arith.constant 0 : index
    %c0_2 = arith.constant 0 : index
    %2 = vector.load %arg2[%c0_1, %c0_2] : memref<16x256xbf16, #tpu.memory_space<vmem>>, vector<16x256xbf16>
    %cst = arith.constant dense<0.000000e+00> : vector<128x256xf32>
    %3 = tpu.matmul %1, %2, %cst {dimension_numbers = #tpu.dot_dimension_numbers<[1], [0], [0], [1], [0, 0, 1, 1], [], []>} : vector<128x16xbf16>, vector<16x256xbf16>, vector<128x256xf32> -> vector<128x256xf32>
    %c0_3 = arith.constant 0 : index
    %c0_4 = arith.constant 0 : index
    %4 = vector.load %arg3[%c0_3, %c0_4] : memref<1x256xf32, #tpu.memory_space<vmem>>, vector<1x256xf32>
    %5 = vector.broadcast %4 : vector<1x256xf32> to vector<128x256xf32>
    %6 = arith.addf %3, %5 : vector<128x256xf32>
    %cst_5 = arith.constant 0.000000e+00 : f32
    %7 = vector.broadcast %cst_5 : f32 to vector<128x256xf32>
    %8 = arith.maximumf %6, %7 : vector<128x256xf32>
    %9 = arith.truncf %8 : vector<128x256xf32> to vector<128x256xbf16>
    %c0_6 = arith.constant 0 : index
    %c0_7 = arith.constant 0 : index
    %10 = vector.load %arg4[%c0_6, %c0_7] : memref<256x256xbf16, #tpu.memory_space<vmem>>, vector<256x256xbf16>
    %cst_8 = arith.constant dense<0.000000e+00> : vector<128x256xf32>
    %11 = tpu.matmul %9, %10, %cst_8 {dimension_numbers = #tpu.dot_dimension_numbers<[1], [0], [0], [1], [0, 0, 1, 1], [], []>} : vector<128x256xbf16>, vector<256x256xbf16>, vector<128x256xf32> -> vector<128x256xf32>
    %c0_9 = arith.constant 0 : index
    %c0_10 = arith.constant 0 : index
    %12 = vector.load %arg5[%c0_9, %c0_10] : memref<1x256xf32, #tpu.memory_space<vmem>>, vector<1x256xf32>
    %13 = vector.broadcast %12 : vector<1x256xf32> to vector<128x256xf32>
    %14 = arith.addf %11, %13 : vector<128x256xf32>
    %cst_11 = arith.constant 0.000000e+00 : f32
    %15 = vector.broadcast %cst_11 : f32 to vector<128x256xf32>
    %16 = arith.maximumf %14, %15 : vector<128x256xf32>
    %17 = arith.truncf %16 : vector<128x256xf32> to vector<128x256xbf16>
    %c0_12 = arith.constant 0 : index
    %c0_13 = arith.constant 0 : index
    %18 = vector.load %arg6[%c0_12, %c0_13] : memref<256x256xbf16, #tpu.memory_space<vmem>>, vector<256x256xbf16>
    %cst_14 = arith.constant dense<0.000000e+00> : vector<128x256xf32>
    %19 = tpu.matmul %17, %18, %cst_14 {dimension_numbers = #tpu.dot_dimension_numbers<[1], [0], [0], [1], [0, 0, 1, 1], [], []>} : vector<128x256xbf16>, vector<256x256xbf16>, vector<128x256xf32> -> vector<128x256xf32>
    %c0_15 = arith.constant 0 : index
    %c0_16 = arith.constant 0 : index
    %20 = vector.load %arg7[%c0_15, %c0_16] : memref<1x256xf32, #tpu.memory_space<vmem>>, vector<1x256xf32>
    %21 = vector.broadcast %20 : vector<1x256xf32> to vector<128x256xf32>
    %22 = arith.addf %19, %21 : vector<128x256xf32>
    %cst_17 = arith.constant 0.000000e+00 : f32
    %23 = vector.broadcast %cst_17 : f32 to vector<128x256xf32>
    %24 = arith.maximumf %22, %23 : vector<128x256xf32>
    %25 = arith.truncf %24 : vector<128x256xf32> to vector<128x256xbf16>
    %c0_18 = arith.constant 0 : index
    %c0_19 = arith.constant 0 : index
    %26 = vector.load %arg8[%c0_18, %c0_19] : memref<256x128xbf16, #tpu.memory_space<vmem>>, vector<256x128xbf16>
    %cst_20 = arith.constant dense<0.000000e+00> : vector<128x128xf32>
    %27 = tpu.matmul %25, %26, %cst_20 {dimension_numbers = #tpu.dot_dimension_numbers<[1], [0], [0], [1], [0, 0, 1, 1], [], []>} : vector<128x256xbf16>, vector<256x128xbf16>, vector<128x128xf32> -> vector<128x128xf32>
    %c0_21 = arith.constant 0 : index
    %c0_22 = arith.constant 0 : index
    %28 = vector.load %arg9[%c0_21, %c0_22] : memref<1x128xf32, #tpu.memory_space<vmem>>, vector<1x128xf32>
    %29 = vector.broadcast %28 : vector<1x128xf32> to vector<128x128xf32>
    %30 = arith.addf %27, %29 : vector<128x128xf32>
    %c0_23 = arith.constant 0 : index
    %c0_24 = arith.constant 0 : index
    %31 = vector.load %arg10[%c0_23, %c0_24] : memref<128x128xf32, #tpu.memory_space<vmem>>, vector<128x128xf32>
    tpu.vector_store %arg10[%c0_23, %c0_24], %30 {strides = array<i32>} : memref<128x128xf32, #tpu.memory_space<vmem>>, vector<128x128xf32>,
    return
  }
  func.func @transform_0(%arg0: i32) -> (i32, i32) {
    %c0_i32 = arith.constant 0 : i32
    %c0_i32_0 = arith.constant 0 : i32
    return %arg0, %c0_i32 : i32, i32
  }
  func.func @transform_1(%arg0: i32) -> (i32, i32) {
    %c0_i32 = arith.constant 0 : i32
    %c0_i32_0 = arith.constant 0 : i32
    %c0_i32_1 = arith.constant 0 : i32
    return %c0_i32, %c0_i32_0 : i32, i32
  }
  func.func @transform_2(%arg0: i32) -> (i32, i32) {
    %c0_i32 = arith.constant 0 : i32
    %c0_i32_0 = arith.constant 0 : i32
    %c0_i32_1 = arith.constant 0 : i32
    return %c0_i32, %c0_i32_0 : i32, i32
  }
  func.func @transform_3(%arg0: i32) -> (i32, i32) {
    %c0_i32 = arith.constant 0 : i32
    %c0_i32_0 = arith.constant 0 : i32
    %c0_i32_1 = arith.constant 0 : i32
    return %c0_i32, %c0_i32_0 : i32, i32
  }
  func.func @transform_4(%arg0: i32) -> (i32, i32) {
    %c0_i32 = arith.constant 0 : i32
    %c0_i32_0 = arith.constant 0 : i32
    %c0_i32_1 = arith.constant 0 : i32
    return %c0_i32, %c0_i32_0 : i32, i32
  }
  func.func @transform_5(%arg0: i32) -> (i32, i32) {
    %c0_i32 = arith.constant 0 : i32
    %c0_i32_0 = arith.constant 0 : i32
    %c0_i32_1 = arith.constant 0 : i32
    return %c0_i32, %c0_i32_0 : i32, i32
  }
  func.func @transform_6(%arg0: i32) -> (i32, i32) {
    %c0_i32 = arith.constant 0 : i32
    %c0_i32_0 = arith.constant 0 : i32
    %c0_i32_1 = arith.constant 0 : i32
    return %c0_i32, %c0_i32_0 : i32, i32
  }
  func.func @transform_7(%arg0: i32) -> (i32, i32) {
    %c0_i32 = arith.constant 0 : i32
    %c0_i32_0 = arith.constant 0 : i32
    %c0_i32_1 = arith.constant 0 : i32
    return %c0_i32, %c0_i32_0 : i32, i32
  }
  func.func @transform_8(%arg0: i32) -> (i32, i32) {
    %c0_i32 = arith.constant 0 : i32
    %c0_i32_0 = arith.constant 0 : i32
    %c0_i32_1 = arith.constant 0 : i32
    return %c0_i32, %c0_i32_0 : i32, i32
  }
  func.func @transform_9(%arg0: i32) -> (i32, i32) {
    %c0_i32 = arith.constant 0 : i32
    %c0_i32_0 = arith.constant 0 : i32
    return %arg0, %c0_i32 : i32, i32
  }
}

</mosaic_0001>

<bundles_post_ra>
// kernel: tpu_custom_call.1
= control target key start
LH: loop header
LB: loop body
LE: loop exit
PB: predicated region body
PF: predicated region fallthrough
CT: control target
= control target key end

     0   :  { %14 = vsyncpa [#allocation3], 0  ;;  %s2039_s0 = inlined_call_operand.vmem [shape: f32[128,16], index: 0, kind: input, shape index: {}]   ;;  %s2040_s1 = inlined_call_operand.vmem [shape: bf16[16,256], index: 1, kind: input, shape index: {}]   ;;  %s2041_s2 = inlined_call_operand.vmem [shape: f32[1,256], index: 2, kind: input, shape index: {}]   ;;  %s2042_s3 = inlined_call_operand.hbm [shape: bf16[256,256], index: 3, kind: input, shape index: {}]   ;;  %s2043_s4 = inlined_call_operand.vmem [shape: f32[1,256], index: 4, kind: input, shape index: {}]   ;;  %s2044_s5 = inlined_call_operand.hbm [shape: bf16[256,256], index: 5, kind: input, shape index: {}]   ;;  %s2045_s6 = inlined_call_operand.vmem [shape: f32[1,256], index: 6, kind: input, shape index: {}]   ;;  %s2046_s7 = inlined_call_operand.vmem [shape: bf16[256,128], index: 7, kind: input, shape index: {}]   ;;  %s2047_s8 = inlined_call_operand.vmem [shape: f32[1,128], index: 8, kind: input, shape index: {}]   ;;  %s2048_s9 = inlined_call_operand.hbm [shape: f32[128,128], index: 9, kind: output, shape index: {}]  }
   0x1   :  { %15 = vsyncpa [#allocation6], 0 }
   0x2   :  { %16 = vsyncpa [#allocation4], 0  ;;  %s1656_s30 = smov [#allocation2]   ;;  %s1584_s13 = scalar_lea.hbm %s2042_s3, 4096 }
   0x3   :  { %s28_s10 = sshll.u32 %s1656_s30, 4  ;;  %p1585_p0 = scmp.ne.s32.totalorder %s2042_s3, %s1584_s13  ;;  %s29_s10 = int_to_ptr.vmem [resolvable:$true] %s28_s10 }
   0x4   :  { %p1588_p1 = scmp.lt.u32.totalorder %s1584_s13, %s2042_s3 }
   0x6   :  { %p1590_p2 = pnand %p1588_p1, %p1585_p0 }
   0x8   :  { %1593 = shalt.err (!%p1590_p2)
}
   0x9   :  { %s1594_s18 = scalar_lea.vmem %s29_s10, 4096  ;;  %p1599_p4 = scmp.lt.s32.totalorder %s29_s10, %s29_s10 }
   0xa   :  { %p1595_p3 = scmp.ne.s32.totalorder %s29_s10, %s1594_s18  ;;  %p1600_p5 = scmp.lt.s32.totalorder %s1594_s18, %s1594_s18 }
   0xc   :  { %p1601_p6 = por %p1600_p5, %p1599_p4 }
   0xe   :  { %p1602_p7 = pnand %p1601_p6, %p1595_p3 }
  0x10   :  { %1605 = shalt.err (!%p1602_p7)
}
  0x11   :  { %s1657_s19 = smov 128   ;;  %s1658_s20 = smov 8  }
  0x12   :  { %34 = dma.hbm_to_vmem [thread:$0]  %s2042_s3, 4096, %s29_s10, [#allocation3], %s1657_s19, %s1657_s19, %s1658_s20  }
  0x13   :  { %s1659_s23 = smov [#allocation5]   ;;  %s1606_s27 = scalar_lea.hbm %s2044_s5, 4096 }
  0x14   :  { %s42_s24 = sshll.u32 %s1659_s23, 4  ;;  %p1607_p8 = scmp.ne.s32.totalorder %s2044_s5, %s1606_s27  ;;  %s43_s24 = int_to_ptr.vmem [resolvable:$true] %s42_s24 }
  0x15   :  { %p1610_p9 = scmp.lt.u32.totalorder %s1606_s27, %s2044_s5 }
  0x17   :  { %p1612_p10 = pnand %p1610_p9, %p1607_p8 }
  0x19   :  { %1615 = shalt.err (!%p1612_p10)
}
  0x1a   :  { %s1616_s12 = scalar_lea.vmem %s43_s24, 4096  ;;  %p1621_p12 = scmp.lt.s32.totalorder %s43_s24, %s43_s24 }
  0x1b   :  { %p1617_p11 = scmp.ne.s32.totalorder %s43_s24, %s1616_s12  ;;  %p1622_p13 = scmp.lt.s32.totalorder %s1616_s12, %s1616_s12 }
  0x1d   :  { %p1623_p0 = por %p1622_p13, %p1621_p12 }
  0x1f   :  { %p1624_p1 = pnand %p1623_p0, %p1617_p11 }
  0x21   :  { %1627 = shalt.err (!%p1624_p1)
}
  0x22   :  { %48 = dma.hbm_to_vmem [thread:$0]  %s2044_s5, 4096, %s43_s24, [#allocation6], %s1657_s19, %s1657_s19, %s1658_s20  }
  0x23   :  { %1650 = dma.done.wait [#allocation3], 4096  }
  0x24   :  { %1651 = vsyncadd [#allocation3], 4294963200 }
  0x25   :  { %1652 = dma.done.wait [#allocation6], 4096  }
  0x26   :  { %1653 = vsyncadd [#allocation6], 4294963200  ;;  %v1660_v0 = vmov 0   ;;  %v1469_v1 = vld [vmem:[%s2040_s1 + $0x4] ss:$8 sps:$4 sm:$0xff]   ;;  %vm110_vm0 = vcmask 130048  }
  0x27   :  { %167 = vmatprep.mubr.bf16.mxu0 %v1660_v0  ;;  %v1471_v2 = vld [vmem:[%s2040_s1] ss:$8 sps:$4 sm:$0xff]   ;;  %135 = vmatprep.subr.bf16.mxu0 %v1469_v1  ;;  %v64_v6 = vld [vmem:[%s2039_s0 + $0x10] sm:$0xff]  ;;  %v65_v7 = vld [vmem:[%s2039_s0 + $0x18] sm:$0xff] }
  0x28   :  { %v62_v3 = vld [vmem:[%s2039_s0] sm:$0xff]  ;;  %v63_v4 = vld [vmem:[%s2039_s0 + $0x8] sm:$0xff]  ;;  %136 = vmatpush1.bf16.msra.mxu0 %v1471_v2  ;;  %v1472_v8 = vld [vmem:[#allocation2 + $0x4] ss:$8 sps:$4 sm:$0xff]   ;;  %v79_v11 = vpack.c.bf16 %v65_v7, %v64_v6 }
  0x29   :  { %v78_v5 = vpack.c.bf16 %v63_v4, %v62_v3  ;;  %v1474_v9 = vld [vmem:[#allocation2] ss:$8 sps:$4 sm:$0xff]   ;;  %v1475_v10 = vld [vmem:[#allocation2 + $0x14] ss:$8 sps:$4 sm:$0xff]   ;;  %500 = vmatprep.subr.bf16.mxu1 %v1472_v8  ;;  %v1477_v12 = vld [vmem:[#allocation2 + $0x10] ss:$8 sps:$4 sm:$0xff]  }
  0x2a   :  { %501 = vmatpush1.bf16.msra.mxu1 %v1474_v9  ;;  %v1478_v13 = vld [vmem:[#allocation2 + $0x24] ss:$8 sps:$4 sm:$0xff]   ;;  %v66_v14 = vld [vmem:[%s2039_s0 + $0x20] sm:$0xff]  ;;  %v1480_v15 = vld [vmem:[#allocation2 + $0x20] ss:$8 sps:$4 sm:$0xff]  }
  0x2b   :  { %1294 = vmatmul.mubr.msk.bf16.vlgmr.msra.gmra.mrb[0].mxu0 %vm110_vm0, %v78_v5  ;;  %502 = vmatprep.subr.bf16.mxu1 %v1475_v10  ;;  %v67_v16 = vld [vmem:[%s2039_s0 + $0x28] sm:$0xff]  ;;  %v1484_v20 = vld [vmem:[#allocation2 + $0x44] ss:$8 sps:$4 sm:$0xff]   ;;  %v1486_v22 = vld [vmem:[#allocation2 + $0x40] ss:$8 sps:$4 sm:$0xff]  }
  0x2c   :  { %177 = vmatprep.mubr.bf16.mxu0 %v1660_v0  ;;  %v1481_v17 = vld [vmem:[#allocation2 + $0x34] ss:$8 sps:$4 sm:$0xff]   ;;  %v80_v18 = vpack.c.bf16 %v67_v16, %v66_v14  ;;  %v1483_v19 = vld [vmem:[#allocation2 + $0x30] ss:$8 sps:$4 sm:$0xff]   ;;  %v68_v21 = vld [vmem:[%s2039_s0 + $0x30] sm:$0xff] }
  0x2d   :  { %v69_v23 = vld [vmem:[%s2039_s0 + $0x38] sm:$0xff]  ;;  %v1487_v24 = vld [vmem:[#allocation2 + $0x54] ss:$8 sps:$4 sm:$0xff]   ;;  %v1489_v25 = vld [vmem:[#allocation2 + $0x50] ss:$8 sps:$4 sm:$0xff]  }
  0x2e   :  { %503 = vmatpush1.bf16.msra.mxu1 %v1477_v12  ;;  %v1490_v26 = vld [vmem:[#allocation2 + $0x64] ss:$8 sps:$4 sm:$0xff]   ;;  %v81_v27 = vpack.c.bf16 %v69_v23, %v68_v21  ;;  %v1492_v28 = vld [vmem:[#allocation2 + $0x60] ss:$8 sps:$4 sm:$0xff]   ;;  %v70_v29 = vld [vmem:[%s2039_s0 + $0x40] sm:$0xff] }
  0x2f   :  { %504 = vmatprep.subr.bf16.mxu1 %v1478_v13  ;;  %v71_v30 = vld [vmem:[%s2039_s0 + $0x48] sm:$0xff]  ;;  %v1496_v33 = vld [vmem:[#allocation2 + $0x84] ss:$8 sps:$4 sm:$0xff]   ;;  %v1498_v35 = vld [vmem:[#allocation2 + $0x80] ss:$8 sps:$4 sm:$0xff]  }
  0x30   :  { %v1493_v31 = vld [vmem:[#allocation2 + $0x74] ss:$8 sps:$4 sm:$0xff]   ;;  %v1495_v32 = vld [vmem:[#allocation2 + $0x70] ss:$8 sps:$4 sm:$0xff]   ;;  %v82_v34 = vpack.c.bf16 %v71_v30, %v70_v29  ;;  %v72_v36 = vld [vmem:[%s2039_s0 + $0x50] sm:$0xff] }
  0x31   :  { %v73_v37 = vld [vmem:[%s2039_s0 + $0x58] sm:$0xff]  ;;  %v1499_v38 = vld [vmem:[#allocation2 + $0x94] ss:$8 sps:$4 sm:$0xff]   ;;  %v1501_v39 = vld [vmem:[#allocation2 + $0x90] ss:$8 sps:$4 sm:$0xff]  }
  0x32   :  { %505 = vmatpush1.bf16.msra.mxu1 %v1480_v15  ;;  %v1502_v40 = vld [vmem:[#allocation2 + $0xa4] ss:$8 sps:$4 sm:$0xff]   ;;  %v83_v41 = vpack.c.bf16 %v73_v37, %v72_v36  ;;  %v1504_v42 = vld [vmem:[#allocation2 + $0xa0] ss:$8 sps:$4 sm:$0xff]   ;;  %v74_v43 = vld [vmem:[%s2039_s0 + $0x60] sm:$0xff] }
  0x33   :  { %1295 = vmatmul.mubr.msk.bf16.gmra.mrb[4].mxu0 %vm110_vm0, %v79_v11  ;;  %506 = vmatprep.subr.bf16.mxu1 %v1481_v17  ;;  %v75_v44 = vld [vmem:[%s2039_s0 + $0x68] sm:$0xff]  ;;  %v1508_v48 = vld [vmem:[#allocation2 + $0xc4] ss:$8 sps:$4 sm:$0xff]   ;;  %v1510_v49 = vld [vmem:[#allocation2 + $0xc0] ss:$8 sps:$4 sm:$0xff]  }
  0x34   :  { %187 = vmatprep.mubr.bf16.mxu0 %v1660_v0  ;;  %v1505_v45 = vld [vmem:[#allocation2 + $0xb4] ss:$8 sps:$4 sm:$0xff]   ;;  %v84_v46 = vpack.c.bf16 %v75_v44, %v74_v43  ;;  %v1507_v47 = vld [vmem:[#allocation2 + $0xb0] ss:$8 sps:$4 sm:$0xff]   ;;  %v76_v50 = vld [vmem:[%s2039_s0 + $0x70] sm:$0xff] }
  0x35   :  { %v77_v51 = vld [vmem:[%s2039_s0 + $0x78] sm:$0xff]  ;;  %v1511_v52 = vld [vmem:[#allocation2 + $0xd4] ss:$8 sps:$4 sm:$0xff]   ;;  %v1513_v54 = vld [vmem:[#allocation2 + $0xd0] ss:$8 sps:$4 sm:$0xff]  }
  0x36   :  { %507 = vmatpush1.bf16.msra.mxu1 %v1483_v19  ;;  %v85_v53 = vpack.c.bf16 %v77_v51, %v76_v50  ;;  %v1514_v55 = vld [vmem:[#allocation2 + $0xe4] ss:$8 sps:$4 sm:$0xff]   ;;  %v1516_v56 = vld [vmem:[#allocation2 + $0xe0] ss:$8 sps:$4 sm:$0xff]   ;;  %v1517_v57 = vld [vmem:[#allocation2 + $0xf4] ss:$8 sps:$4 sm:$0xff]  }
  0x37   :  { %508 = vmatprep.subr.bf16.mxu1 %v1484_v20  ;;  %v1519_v58 = vld [vmem:[#allocation2 + $0xf0] ss:$8 sps:$4 sm:$0xff]   ;;  %v1520_v59 = vld [vmem:[#allocation5] ss:$8 sps:$4 sm:$0xff]   ;;  %v1522_v60 = vld [vmem:[#allocation5 + $0x4] ss:$8 sps:$4 sm:$0xff]   ;;  %v90_v20 = vlaneseq }
  0x38   :  { %v1525_v61 = vld [vmem:[#allocation5 + $0x14] ss:$8 sps:$4 sm:$0xff]   ;;  %865 = vmatprep.subr.bf16.mxu0 %v1522_v60  ;;  %v1523_v62 = vld [vmem:[#allocation5 + $0x10] ss:$8 sps:$4 sm:$0xff]   ;;  %v1528_v63 = vld [vmem:[#allocation5 + $0x24] ss:$8 sps:$4 sm:$0xff]  }
  0x39   :  { %866 = vmatpush1.bf16.msra.mxu0 %v1520_v59  ;;  %v1531_v1 = vld [vmem:[#allocation5 + $0x34] ss:$8 sps:$4 sm:$0xff]   ;;  %v1529_v2 = vld [vmem:[#allocation5 + $0x30] ss:$8 sps:$4 sm:$0xff]   ;;  %v1534_v3 = vld [vmem:[#allocation5 + $0x44] ss:$8 sps:$4 sm:$0xff]  }
  0x3a   :  { %509 = vmatpush1.bf16.msra.mxu1 %v1486_v22  ;;  %867 = vmatprep.subr.bf16.mxu0 %v1525_v61  ;;  %v1532_v4 = vld [vmem:[#allocation5 + $0x40] ss:$8 sps:$4 sm:$0xff]   ;;  %v1537_v5 = vld [vmem:[#allocation5 + $0x54] ss:$8 sps:$4 sm:$0xff]   ;;  %v1535_v6 = vld [vmem:[#allocation5 + $0x50] ss:$8 sps:$4 sm:$0xff]  }
  0x3b   :  { %1296 = vmatmul.mubr.msk.bf16.gmra.mrb[8].mxu0 %vm110_vm0, %v80_v18  ;;  %510 = vmatprep.subr.bf16.mxu1 %v1487_v24  ;;  %v1540_v7 = vld [vmem:[#allocation5 + $0x64] ss:$8 sps:$4 sm:$0xff]   ;;  %v1538_v8 = vld [vmem:[#allocation5 + $0x60] ss:$8 sps:$4 sm:$0xff]   ;;  %v1543_v9 = vld [vmem:[#allocation5 + $0x74] ss:$8 sps:$4 sm:$0xff]  }
  0x3c   :  { %197 = vmatprep.mubr.bf16.mxu0 %v1660_v0  ;;  %v1541_v10 = vld [vmem:[#allocation5 + $0x70] ss:$8 sps:$4 sm:$0xff]   ;;  %v1546_v11 = vld [vmem:[#allocation5 + $0x84] ss:$8 sps:$4 sm:$0xff]   ;;  %v1544_v12 = vld [vmem:[#allocation5 + $0x80] ss:$8 sps:$4 sm:$0xff]  }
  0x3d   :  { %868 = vmatpush1.bf16.msra.mxu0 %v1523_v62  ;;  %v1549_v13 = vld [vmem:[#allocation5 + $0x94] ss:$8 sps:$4 sm:$0xff]   ;;  %v1547_v14 = vld [vmem:[#allocation5 + $0x90] ss:$8 sps:$4 sm:$0xff]   ;;  %v1552_v15 = vld [vmem:[#allocation5 + $0xa4] ss:$8 sps:$4 sm:$0xff]  }
  0x3e   :  { %511 = vmatpush1.bf16.msra.mxu1 %v1489_v25  ;;  %869 = vmatprep.subr.bf16.mxu0 %v1528_v63  ;;  %v1550_v16 = vld [vmem:[#allocation5 + $0xa0] ss:$8 sps:$4 sm:$0xff]   ;;  %v1555_v17 = vld [vmem:[#allocation5 + $0xb4] ss:$8 sps:$4 sm:$0xff]   ;;  %v1553_v18 = vld [vmem:[#allocation5 + $0xb0] ss:$8 sps:$4 sm:$0xff]  }
  0x3f   :  { %512 = vmatprep.subr.bf16.mxu1 %v1490_v26  ;;  %v1558_v19 = vld [vmem:[#allocation5 + $0xc4] ss:$8 sps:$4 sm:$0xff]   ;;  %v1556_v21 = vld [vmem:[#allocation5 + $0xc0] ss:$8 sps:$4 sm:$0xff]   ;;  %v1561_v22 = vld [vmem:[#allocation5 + $0xd4] ss:$8 sps:$4 sm:$0xff]  }
  0x40   :  { %v91_v23 = vshrl.u32 %v90_v20, 7  ;;  %v1559_v24 = vld [vmem:[#allocation5 + $0xd0] ss:$8 sps:$4 sm:$0xff]  }
  0x41   :  { %v88_v26 = vld [vmem:[%s2041_s2] sm:$0x3] }
  0x42   :  { %513 = vmatpush1.bf16.msra.mxu1 %v1492_v28  ;;  %v1812_v25 = vsub.s32 0, %v91_v23 }
  0x43   :  { %1297 = vmatmul.mubr.msk.bf16.gmra.mrb[12].mxu0 %vm110_vm0, %v81_v27  ;;  %514 = vmatprep.subr.bf16.mxu1 %v1493_v31  ;;  %v1817_v27 = vsub.s32 1, %v91_v23 }
  0x44   :  { %207 = vmatprep.mubr.bf16.mxu0 %v1660_v0  ;;  %v1820_v28 = vrot.slane %v88_v26, %v1812_v25 }
  0x45   :  { %v1823_v29 = vrot.slane %v88_v26, %v1817_v27 }
  0x46   :  { %515 = vmatpush1.bf16.msra.mxu1 %v1495_v32 }
  0x47   :  { %516 = vmatprep.subr.bf16.mxu1 %v1496_v33 }
  0x4a   :  { %517 = vmatpush1.bf16.msra.mxu1 %v1498_v35 }
  0x4b   :  { %1298 = vmatmul.mubr.msk.bf16.gmra.mrb[16].mxu0 %vm110_vm0, %v82_v34  ;;  %518 = vmatprep.subr.bf16.mxu1 %v1499_v38 }
  0x4c   :  { %217 = vmatprep.mubr.bf16.mxu0 %v1660_v0 }
  0x4e   :  { %519 = vmatpush1.bf16.msra.mxu1 %v1501_v39 }
  0x4f   :  { %520 = vmatprep.subr.bf16.mxu1 %v1502_v40 }
  0x52   :  { %521 = vmatpush1.bf16.msra.mxu1 %v1504_v42 }
  0x53   :  { %1299 = vmatmul.mubr.msk.bf16.gmra.mrb[20].mxu0 %vm110_vm0, %v83_v41  ;;  %522 = vmatprep.subr.bf16.mxu1 %v1505_v45 }
  0x54   :  { %227 = vmatprep.mubr.bf16.mxu0 %v1660_v0 }
  0x56   :  { %523 = vmatpush1.bf16.msra.mxu1 %v1507_v47 }
  0x57   :  { %524 = vmatprep.subr.bf16.mxu1 %v1508_v48 }
  0x5a   :  { %525 = vmatpush1.bf16.msra.mxu1 %v1510_v49 }
  0x5b   :  { %1300 = vmatmul.mubr.msk.bf16.gmra.mrb[24].mxu0 %vm110_vm0, %v84_v46  ;;  %526 = vmatprep.subr.bf16.mxu1 %v1511_v52 }
  0x5c   :  { %237 = vmatprep.mubr.bf16.mxu0 %v1660_v0  ;;  %v1526_v0 = vld [vmem:[#allocation5 + $0x20] ss:$8 sps:$4 sm:$0xff]  }
  0x5d   :  { %870 = vmatpush1.bf16.msra.mxu0 %v1526_v0 }
  0x5e   :  { %527 = vmatpush1.bf16.msra.mxu1 %v1513_v54  ;;  %871 = vmatprep.subr.bf16.mxu0 %v1531_v1 }
  0x5f   :  { %528 = vmatprep.subr.bf16.mxu1 %v1514_v55 }
  0x61   :  { %872 = vmatpush1.bf16.msra.mxu0 %v1529_v2 }
  0x62   :  { %529 = vmatpush1.bf16.msra.mxu1 %v1516_v56  ;;  %873 = vmatprep.subr.bf16.mxu0 %v1534_v3 }
  0x63   :  { %1301 = vmatmul.mubr.msk.bf16.gmra.mrb[28].mxu0 %vm110_vm0, %v85_v53  ;;  %530 = vmatprep.subr.bf16.mxu1 %v1517_v57 }
  0x65   :  { %874 = vmatpush1.bf16.msra.mxu0 %v1532_v4 }
  0x66   :  { %531 = vmatpush1.bf16.msra.mxu1 %v1519_v58  ;;  %875 = vmatprep.subr.bf16.mxu0 %v1537_v5 }
  0x69   :  { %876 = vmatpush1.bf16.msra.mxu0 %v1535_v6 }
  0x6a   :  { %877 = vmatprep.subr.bf16.mxu0 %v1540_v7 }
  0x6d   :  { %878 = vmatpush1.bf16.msra.mxu0 %v1538_v8 }
  0x6e   :  { %879 = vmatprep.subr.bf16.mxu0 %v1543_v9 }
  0x71   :  { %880 = vmatpush1.bf16.msra.mxu0 %v1541_v10 }
  0x72   :  { %881 = vmatprep.subr.bf16.mxu0 %v1546_v11 }
  0x75   :  { %882 = vmatpush1.bf16.msra.mxu0 %v1544_v12 }
  0x76   :  { %883 = vmatprep.subr.bf16.mxu0 %v1549_v13 }
  0x79   :  { %884 = vmatpush1.bf16.msra.mxu0 %v1547_v14 }
  0x7a   :  { %885 = vmatprep.subr.bf16.mxu0 %v1552_v15 }
  0x7d   :  { %886 = vmatpush1.bf16.msra.mxu0 %v1550_v16 }
  0x7e   :  { %887 = vmatprep.subr.bf16.mxu0 %v1555_v17 }
  0x81   :  { %888 = vmatpush1.bf16.msra.mxu0 %v1553_v18 }
  0x82   :  { %889 = vmatprep.subr.bf16.mxu0 %v1558_v19 }
  0x85   :  { %890 = vmatpush1.bf16.msra.mxu0 %v1556_v21 }
  0x86   :  { %891 = vmatprep.subr.bf16.mxu0 %v1561_v22 }
  0x89   :  { %892 = vmatpush1.bf16.msra.mxu0 %v1559_v24 }
  0xfe   :  { %v169_v30 = vpop.f32.mrb[0].mxu0 }
  0xff   :  { %v170_v31 = vadd.f32 %v169_v30, %v1820_v28  ;;  %v171_v32 = vpop.f32.mrb[1].mxu0 }
 0x100   :  { %v172_v33 = vadd.f32 %v171_v32, %v1823_v29  ;;  %v173_v34 = vpop.f32.mrb[2].mxu0 }
 0x101   :  { %v174_v35 = vadd.f32 %v173_v34, %v1820_v28  ;;  %v175_v36 = vpop.f32.mrb[3].mxu0  ;;  %v248_v38 = vmax.f32 %v170_v31, 0.0 }
 0x102   :  { %v176_v37 = vadd.f32 %v175_v36, %v1823_v29  ;;  %v249_v40 = vmax.f32 %v172_v33, 0.0 }
 0x103   :  { %v250_v39 = vmax.f32 %v174_v35, 0.0 }
 0x104   :  { %v251_v41 = vmax.f32 %v176_v37, 0.0 }
 0x105   :  { %v280_v42 = vpack.c.bf16 %v250_v39, %v248_v38 }
 0x106   :  { %v179_v43 = vpop.f32.mrb[4].mxu0  ;;  %v281_v44 = vpack.c.bf16 %v251_v41, %v249_v40 }
 0x107   :  { %v180_v45 = vadd.f32 %v179_v43, %v1820_v28  ;;  %v181_v46 = vpop.f32.mrb[5].mxu0 }
 0x108   :  { %v182_v47 = vadd.f32 %v181_v46, %v1823_v29  ;;  %v183_v48 = vpop.f32.mrb[6].mxu0  ;;  %532 = vmatprep.mubr.bf16.mxu1 %v281_v44 }
 0x109   :  { %v184_v49 = vadd.f32 %v183_v48, %v1820_v28  ;;  %v185_v50 = vpop.f32.mrb[7].mxu0  ;;  %533 = vmatmul.mubr.bf16.vlgmr.msra.gmra.mrb[0].mxu1 %v280_v42  ;;  %v252_v52 = vmax.f32 %v180_v45, 0.0 }
 0x10a   :  { %v186_v51 = vadd.f32 %v185_v50, %v1823_v29  ;;  %v253_v54 = vmax.f32 %v182_v47, 0.0 }
 0x10b   :  { %v254_v53 = vmax.f32 %v184_v49, 0.0 }
 0x10c   :  { %v255_v55 = vmax.f32 %v186_v51, 0.0 }
 0x10d   :  { %v282_v56 = vpack.c.bf16 %v254_v53, %v252_v52 }
 0x10e   :  { %v283_v57 = vpack.c.bf16 %v255_v55, %v253_v54  ;;  %v189_v58 = vpop.f32.mrb[8].mxu0 }
 0x10f   :  { %v190_v59 = vadd.f32 %v189_v58, %v1820_v28  ;;  %v191_v60 = vpop.f32.mrb[9].mxu0 }
 0x110   :  { %v192_v61 = vadd.f32 %v191_v60, %v1823_v29  ;;  %v193_v62 = vpop.f32.mrb[10].mxu0  ;;  %542 = vmatprep.mubr.bf16.mxu1 %v283_v57 }
 0x111   :  { %v194_v63 = vadd.f32 %v193_v62, %v1820_v28  ;;  %v195_v0 = vpop.f32.mrb[11].mxu0  ;;  %543 = vmatmul.mubr.bf16.gmra.mrb[4].mxu1 %v282_v56  ;;  %v256_v2 = vmax.f32 %v190_v59, 0.0 }
 0x112   :  { %v196_v1 = vadd.f32 %v195_v0, %v1823_v29  ;;  %v257_v4 = vmax.f32 %v192_v61, 0.0 }
 0x113   :  { %v258_v3 = vmax.f32 %v194_v63, 0.0 }
 0x114   :  { %v259_v5 = vmax.f32 %v196_v1, 0.0 }
 0x115   :  { %v284_v6 = vpack.c.bf16 %v258_v3, %v256_v2 }
 0x116   :  { %v285_v7 = vpack.c.bf16 %v259_v5, %v257_v4  ;;  %v199_v8 = vpop.f32.mrb[12].mxu0 }
 0x117   :  { %v200_v9 = vadd.f32 %v199_v8, %v1820_v28  ;;  %v201_v10 = vpop.f32.mrb[13].mxu0 }
 0x118   :  { %v202_v11 = vadd.f32 %v201_v10, %v1823_v29  ;;  %v203_v12 = vpop.f32.mrb[14].mxu0  ;;  %552 = vmatprep.mubr.bf16.mxu1 %v285_v7 }
 0x119   :  { %v204_v13 = vadd.f32 %v203_v12, %v1820_v28  ;;  %v205_v14 = vpop.f32.mrb[15].mxu0  ;;  %553 = vmatmul.mubr.bf16.gmra.mrb[8].mxu1 %v284_v6  ;;  %v260_v16 = vmax.f32 %v200_v9, 0.0 }
 0x11a   :  { %v206_v15 = vadd.f32 %v205_v14, %v1823_v29  ;;  %v261_v18 = vmax.f32 %v202_v11, 0.0 }
 0x11b   :  { %v262_v17 = vmax.f32 %v204_v13, 0.0 }
 0x11c   :  { %v263_v19 = vmax.f32 %v206_v15, 0.0 }
 0x11d   :  { %v286_v20 = vpack.c.bf16 %v262_v17, %v260_v16 }
 0x11e   :  { %v287_v21 = vpack.c.bf16 %v263_v19, %v261_v18  ;;  %v209_v22 = vpop.f32.mrb[16].mxu0  ;;  %v1564_v18 = vld [vmem:[#allocation5 + $0xe4] ss:$8 sps:$4 sm:$0xff]   ;;  %v1562_v19 = vld [vmem:[#allocation5 + $0xe0] ss:$8 sps:$4 sm:$0xff]  }
 0x11f   :  { %v210_v23 = vadd.f32 %v209_v22, %v1820_v28  ;;  %v211_v24 = vpop.f32.mrb[17].mxu0  ;;  %893 = vmatprep.subr.bf16.mxu0 %v1564_v18  ;;  %v1570_v22 = vld [vmem:[%s2046_s7 + $0x48] sm:$0xff]  }
 0x120   :  { %v212_v26 = vadd.f32 %v211_v24, %v1823_v29  ;;  %v213_v30 = vpop.f32.mrb[18].mxu0  ;;  %562 = vmatprep.mubr.bf16.mxu1 %v287_v21  ;;  %894 = vmatpush1.bf16.msra.mxu0 %v1562_v19  ;;  %v1565_v21 = vld [vmem:[#allocation5 + $0xf0] ss:$8 sps:$4 sm:$0xff]   ;;  %v1572_v24 = vld [vmem:[%s2046_s7 + $0x50] sm:$0xff]  }
 0x121   :  { %v214_v31 = vadd.f32 %v213_v30, %v1820_v28  ;;  %v215_v32 = vpop.f32.mrb[19].mxu0  ;;  %563 = vmatmul.mubr.bf16.gmra.mrb[12].mxu1 %v286_v20  ;;  %v264_v34 = vmax.f32 %v210_v23, 0.0  ;;  %v1567_v20 = vld [vmem:[#allocation5 + $0xf4] ss:$8 sps:$4 sm:$0xff]   ;;  %v1574_v30 = vld [vmem:[%s2046_s7 + $0x58] sm:$0xff]  }
 0x122   :  { %v216_v33 = vadd.f32 %v215_v32, %v1823_v29  ;;  %v265_v36 = vmax.f32 %v212_v26, 0.0  ;;  %895 = vmatprep.subr.bf16.mxu0 %v1567_v20  ;;  %v1571_v23 = vld [vmem:[%s2046_s7 + $0x8] sm:$0xff]   ;;  %v1573_v26 = vld [vmem:[%s2046_s7 + $0x10] sm:$0xff]   ;;  %v1886_v32 = vld [vmem:[%s2046_s7 + $0x60] sm:$0xff]  }
 0x123   :  { %v266_v35 = vmax.f32 %v214_v31, 0.0  ;;  %v1881_v31 = vld [vmem:[%s2046_s7 + $0x18] sm:$0xff]  }
 0x124   :  { %v267_v37 = vmax.f32 %v216_v33, 0.0  ;;  %896 = vmatpush1.bf16.msra.mxu0 %v1565_v21  ;;  %v1893_v33 = vld [vmem:[%s2046_s7 + $0x20] sm:$0xff]  }
 0x125   :  { %v288_v38 = vpack.c.bf16 %v266_v35, %v264_v34  ;;  %v1898_v34 = vld [vmem:[%s2046_s7 + $0x68] sm:$0xff]   ;;  %v328_v35 = vld [vmem:[%s2043_s4] sm:$0x3] }
 0x126   :  { %v289_v39 = vpack.c.bf16 %v267_v37, %v265_v36  ;;  %v219_v40 = vpop.f32.mrb[20].mxu0  ;;  %v1906_v36 = vrot.slane %v328_v35, %v1812_v25  ;;  %v1909_v37 = vrot.slane %v328_v35, %v1817_v27 }
 0x127   :  { %v220_v41 = vadd.f32 %v219_v40, %v1820_v28  ;;  %v221_v42 = vpop.f32.mrb[21].mxu0 }
 0x128   :  { %v222_v43 = vadd.f32 %v221_v42, %v1823_v29  ;;  %v223_v44 = vpop.f32.mrb[22].mxu0  ;;  %572 = vmatprep.mubr.bf16.mxu1 %v289_v39 }
 0x129   :  { %v224_v45 = vadd.f32 %v223_v44, %v1820_v28  ;;  %v225_v46 = vpop.f32.mrb[23].mxu0  ;;  %573 = vmatmul.mubr.bf16.gmra.mrb[16].mxu1 %v288_v38  ;;  %v268_v48 = vmax.f32 %v220_v41, 0.0 }
 0x12a   :  { %v226_v47 = vadd.f32 %v225_v46, %v1823_v29  ;;  %v269_v50 = vmax.f32 %v222_v43, 0.0 }
 0x12b   :  { %v270_v49 = vmax.f32 %v224_v45, 0.0 }
 0x12c   :  { %v271_v51 = vmax.f32 %v226_v47, 0.0 }
 0x12d   :  { %v290_v52 = vpack.c.bf16 %v270_v49, %v268_v48 }
 0x12e   :  { %v291_v53 = vpack.c.bf16 %v271_v51, %v269_v50  ;;  %v229_v54 = vpop.f32.mrb[24].mxu0 }
 0x12f   :  { %v230_v55 = vadd.f32 %v229_v54, %v1820_v28  ;;  %v231_v56 = vpop.f32.mrb[25].mxu0 }
 0x130   :  { %v232_v57 = vadd.f32 %v231_v56, %v1823_v29  ;;  %v233_v58 = vpop.f32.mrb[26].mxu0  ;;  %582 = vmatprep.mubr.bf16.mxu1 %v291_v53 }
 0x131   :  { %v234_v59 = vadd.f32 %v233_v58, %v1820_v28  ;;  %v235_v60 = vpop.f32.mrb[27].mxu0  ;;  %583 = vmatmul.mubr.bf16.gmra.mrb[20].mxu1 %v290_v52  ;;  %v272_v62 = vmax.f32 %v230_v55, 0.0 }
 0x132   :  { %v236_v61 = vadd.f32 %v235_v60, %v1823_v29  ;;  %v273_v0 = vmax.f32 %v232_v57, 0.0 }
 0x133   :  { %v274_v63 = vmax.f32 %v234_v59, 0.0 }
 0x134   :  { %v275_v1 = vmax.f32 %v236_v61, 0.0 }
 0x135   :  { %v292_v2 = vpack.c.bf16 %v274_v63, %v272_v62 }
 0x136   :  { %v293_v3 = vpack.c.bf16 %v275_v1, %v273_v0  ;;  %v239_v4 = vpop.f32.mrb[28].mxu0 }
 0x137   :  { %v240_v5 = vadd.f32 %v239_v4, %v1820_v28  ;;  %v241_v6 = vpop.f32.mrb[29].mxu0 }
 0x138   :  { %v242_v7 = vadd.f32 %v241_v6, %v1823_v29  ;;  %v243_v8 = vpop.f32.mrb[30].mxu0  ;;  %592 = vmatprep.mubr.bf16.mxu1 %v293_v3 }
 0x139   :  { %v244_v9 = vadd.f32 %v243_v8, %v1820_v28  ;;  %v245_v10 = vpop.f32.mrb[31].mxu0  ;;  %593 = vmatmul.mubr.bf16.gmra.mrb[24].mxu1 %v292_v2  ;;  %v276_v12 = vmax.f32 %v240_v5, 0.0  ;;  %v1568_v28 = vld [vmem:[%s2046_s7 + $0x40] sm:$0xff]  }
 0x13a   :  { %v246_v11 = vadd.f32 %v245_v10, %v1823_v29  ;;  %v277_v14 = vmax.f32 %v242_v7, 0.0  ;;  %v1569_v29 = vld [vmem:[%s2046_s7] sm:$0xff]   ;;  %1447 = vmatprep.subr.bf16.mxu1 %v1568_v28  ;;  %1383 = vmatprep.subr.bf16.mxu0 %v1568_v28 }
 0x13b   :  { %v278_v13 = vmax.f32 %v244_v9, 0.0  ;;  %1455 = vmatpush3.bf16.msra.mxu1 %v1569_v29 }
 0x13c   :  { %v279_v15 = vmax.f32 %v246_v11, 0.0  ;;  %1448 = vmatprep.subr.bf16.mxu1 %v1570_v22 }
 0x13d   :  { %v294_v16 = vpack.c.bf16 %v278_v13, %v276_v12 }
 0x13e   :  { %v295_v17 = vpack.c.bf16 %v279_v15, %v277_v14 }
 0x13f   :  { %1456 = vmatpush3.bf16.msra.mxu1 %v1571_v23 }
 0x140   :  { %602 = vmatprep.mubr.bf16.mxu1 %v295_v17  ;;  %1449 = vmatprep.subr.bf16.mxu1 %v1572_v24 }
 0x141   :  { %603 = vmatmul.mubr.bf16.gmra.mrb[28].mxu1 %v294_v16 }
 0x143   :  { %1457 = vmatpush3.bf16.msra.mxu1 %v1573_v26 }
 0x144   :  { %1450 = vmatprep.subr.bf16.mxu1 %v1574_v30 }
 0x147   :  { %1458 = vmatpush3.bf16.msra.mxu1 %v1881_v31 }
 0x148   :  { %1451 = vmatprep.subr.bf16.mxu1 %v1886_v32 }
 0x14b   :  { %1459 = vmatpush3.bf16.msra.mxu1 %v1893_v33 }
 0x14c   :  { %1452 = vmatprep.subr.bf16.mxu1 %v1898_v34 }
 0x1dc   :  { %v534_v38 = vpop.f32.mrb[0].mxu1 }
 0x1dd   :  { %v535_v39 = vadd.f32 %v534_v38, %v1906_v36  ;;  %v536_v40 = vpop.f32.mrb[1].mxu1 }
 0x1de   :  { %v537_v41 = vadd.f32 %v536_v40, %v1909_v37  ;;  %v538_v42 = vpop.f32.mrb[2].mxu1 }
 0x1df   :  { %v539_v43 = vadd.f32 %v538_v42, %v1906_v36  ;;  %v540_v44 = vpop.f32.mrb[3].mxu1  ;;  %v613_v46 = vmax.f32 %v535_v39, 0.0 }
 0x1e0   :  { %v541_v45 = vadd.f32 %v540_v44, %v1909_v37  ;;  %v614_v48 = vmax.f32 %v537_v41, 0.0 }
 0x1e1   :  { %v615_v47 = vmax.f32 %v539_v43, 0.0 }
 0x1e2   :  { %v616_v49 = vmax.f32 %v541_v45, 0.0 }
 0x1e3   :  { %v645_v50 = vpack.c.bf16 %v615_v47, %v613_v46 }
 0x1e4   :  { %v646_v51 = vpack.c.bf16 %v616_v49, %v614_v48  ;;  %v544_v52 = vpop.f32.mrb[4].mxu1 }
 0x1e5   :  { %v545_v53 = vadd.f32 %v544_v52, %v1906_v36  ;;  %v546_v54 = vpop.f32.mrb[5].mxu1 }
 0x1e6   :  { %v547_v55 = vadd.f32 %v546_v54, %v1909_v37  ;;  %v548_v56 = vpop.f32.mrb[6].mxu1  ;;  %897 = vmatprep.mubr.bf16.mxu0 %v646_v51 }
 0x1e7   :  { %v549_v57 = vadd.f32 %v548_v56, %v1906_v36  ;;  %v550_v58 = vpop.f32.mrb[7].mxu1  ;;  %898 = vmatmul.mubr.bf16.vlgmr.msra.gmra.mrb[32].mxu0 %v645_v50  ;;  %v617_v60 = vmax.f32 %v545_v53, 0.0 }
 0x1e8   :  { %v551_v59 = vadd.f32 %v550_v58, %v1909_v37  ;;  %1384 = vmatpush3.bf16.msra.mxu0 %v1569_v29  ;;  %v618_v62 = vmax.f32 %v547_v55, 0.0 }
 0x1e9   :  { %v619_v61 = vmax.f32 %v549_v57, 0.0  ;;  %1385 = vmatprep.subr.bf16.mxu0 %v1570_v22 }
 0x1ea   :  { %v620_v63 = vmax.f32 %v551_v59, 0.0 }
 0x1eb   :  { %v647_v0 = vpack.c.bf16 %v619_v61, %v617_v60 }
 0x1ec   :  { %v648_v1 = vpack.c.bf16 %v620_v63, %v618_v62  ;;  %v554_v2 = vpop.f32.mrb[8].mxu1  ;;  %1386 = vmatpush3.bf16.msra.mxu0 %v1571_v23 }
 0x1ed   :  { %v555_v3 = vadd.f32 %v554_v2, %v1906_v36  ;;  %v556_v4 = vpop.f32.mrb[9].mxu1  ;;  %1387 = vmatprep.subr.bf16.mxu0 %v1572_v24 }
 0x1ee   :  { %v557_v5 = vadd.f32 %v556_v4, %v1909_v37  ;;  %v558_v6 = vpop.f32.mrb[10].mxu1  ;;  %907 = vmatprep.mubr.bf16.mxu0 %v648_v1 }
 0x1ef   :  { %v559_v7 = vadd.f32 %v558_v6, %v1906_v36  ;;  %v560_v8 = vpop.f32.mrb[11].mxu1  ;;  %908 = vmatmul.mubr.bf16.gmra.mrb[36].mxu0 %v647_v0  ;;  %v621_v10 = vmax.f32 %v555_v3, 0.0 }
 0x1f0   :  { %v561_v9 = vadd.f32 %v560_v8, %v1909_v37  ;;  %1388 = vmatpush3.bf16.msra.mxu0 %v1573_v26  ;;  %v622_v12 = vmax.f32 %v557_v5, 0.0 }
 0x1f1   :  { %v623_v11 = vmax.f32 %v559_v7, 0.0  ;;  %1389 = vmatprep.subr.bf16.mxu0 %v1574_v30 }
 0x1f2   :  { %v624_v13 = vmax.f32 %v561_v9, 0.0 }
 0x1f3   :  { %v649_v14 = vpack.c.bf16 %v623_v11, %v621_v10 }
 0x1f4   :  { %v650_v15 = vpack.c.bf16 %v624_v13, %v622_v12  ;;  %v564_v16 = vpop.f32.mrb[12].mxu1  ;;  %1390 = vmatpush3.bf16.msra.mxu0 %v1881_v31 }
 0x1f5   :  { %v565_v17 = vadd.f32 %v564_v16, %v1906_v36  ;;  %v566_v18 = vpop.f32.mrb[13].mxu1  ;;  %1391 = vmatprep.subr.bf16.mxu0 %v1886_v32 }
 0x1f6   :  { %v567_v19 = vadd.f32 %v566_v18, %v1909_v37  ;;  %v568_v20 = vpop.f32.mrb[14].mxu1  ;;  %917 = vmatprep.mubr.bf16.mxu0 %v650_v15 }
 0x1f7   :  { %v569_v21 = vadd.f32 %v568_v20, %v1906_v36  ;;  %v570_v28 = vpop.f32.mrb[15].mxu1  ;;  %918 = vmatmul.mubr.bf16.gmra.mrb[40].mxu0 %v649_v14  ;;  %v625_v22 = vmax.f32 %v565_v17, 0.0 }
 0x1f8   :  { %v571_v29 = vadd.f32 %v570_v28, %v1909_v37  ;;  %1392 = vmatpush3.bf16.msra.mxu0 %v1893_v33  ;;  %v626_v24 = vmax.f32 %v567_v19, 0.0 }
 0x1f9   :  { %v627_v23 = vmax.f32 %v569_v21, 0.0  ;;  %1393 = vmatprep.subr.bf16.mxu0 %v1898_v34 }
 0x1fa   :  { %v628_v26 = vmax.f32 %v571_v29, 0.0 }
 0x1fb   :  { %v651_v30 = vpack.c.bf16 %v627_v23, %v625_v22 }
 0x1fc   :  { %v652_v31 = vpack.c.bf16 %v628_v26, %v626_v24  ;;  %v574_v32 = vpop.f32.mrb[16].mxu1  ;;  %v1579_v24 = vld [vmem:[%s2046_s7 + $0x28] sm:$0xff]   ;;  %v1582_v26 = vld [vmem:[%s2046_s7 + $0x78] sm:$0xff]  }
 0x1fd   :  { %v575_v35 = vadd.f32 %v574_v32, %v1906_v36  ;;  %v576_v38 = vpop.f32.mrb[17].mxu1  ;;  %1394 = vmatpush3.bf16.msra.mxu0 %v1579_v24  ;;  %1460 = vmatpush3.bf16.msra.mxu1 %v1579_v24 }
 0x1fe   :  { %v577_v39 = vadd.f32 %v576_v38, %v1909_v37  ;;  %v578_v40 = vpop.f32.mrb[18].mxu1  ;;  %927 = vmatprep.mubr.bf16.mxu0 %v652_v31  ;;  %v693_v31 = vld [vmem:[%s2045_s6] sm:$0x3] }
 0x1ff   :  { %v579_v41 = vadd.f32 %v578_v40, %v1906_v36  ;;  %v580_v42 = vpop.f32.mrb[19].mxu1  ;;  %928 = vmatmul.mubr.bf16.gmra.mrb[44].mxu0 %v651_v30  ;;  %v629_v43 = vmax.f32 %v575_v35, 0.0  ;;  %v1583_v30 = vld [vmem:[%s2046_s7 + $0x38] sm:$0xff]   ;;  %v1966_v32 = vrot.slane %v693_v31, %v1812_v25  ;;  %v1969_v35 = vrot.slane %v693_v31, %v1817_v27 }
 0x200   :  { %v581_v33 = vadd.f32 %v580_v42, %v1909_v37  ;;  %v630_v44 = vmax.f32 %v577_v39, 0.0 }
 0x201   :  { %v631_v34 = vmax.f32 %v579_v41, 0.0 }
 0x202   :  { %v632_v45 = vmax.f32 %v581_v33, 0.0 }
 0x203   :  { %v653_v46 = vpack.c.bf16 %v631_v34, %v629_v43 }
 0x204   :  { %v654_v47 = vpack.c.bf16 %v632_v45, %v630_v44  ;;  %v584_v48 = vpop.f32.mrb[20].mxu1 }
 0x205   :  { %v585_v49 = vadd.f32 %v584_v48, %v1906_v36  ;;  %v586_v50 = vpop.f32.mrb[21].mxu1 }
 0x206   :  { %v587_v51 = vadd.f32 %v586_v50, %v1909_v37  ;;  %v588_v52 = vpop.f32.mrb[22].mxu1  ;;  %937 = vmatprep.mubr.bf16.mxu0 %v654_v47 }
 0x207   :  { %v589_v53 = vadd.f32 %v588_v52, %v1906_v36  ;;  %v590_v54 = vpop.f32.mrb[23].mxu1  ;;  %938 = vmatmul.mubr.bf16.gmra.mrb[48].mxu0 %v653_v46  ;;  %v633_v56 = vmax.f32 %v585_v49, 0.0 }
 0x208   :  { %v591_v55 = vadd.f32 %v590_v54, %v1909_v37  ;;  %v634_v58 = vmax.f32 %v587_v51, 0.0 }
 0x209   :  { %v635_v57 = vmax.f32 %v589_v53, 0.0 }
 0x20a   :  { %v636_v59 = vmax.f32 %v591_v55, 0.0 }
 0x20b   :  { %v655_v60 = vpack.c.bf16 %v635_v57, %v633_v56 }
 0x20c   :  { %v656_v61 = vpack.c.bf16 %v636_v59, %v634_v58  ;;  %v594_v62 = vpop.f32.mrb[24].mxu1 }
 0x20d   :  { %v595_v63 = vadd.f32 %v594_v62, %v1906_v36  ;;  %v596_v0 = vpop.f32.mrb[25].mxu1 }
 0x20e   :  { %v597_v1 = vadd.f32 %v596_v0, %v1909_v37  ;;  %v598_v2 = vpop.f32.mrb[26].mxu1  ;;  %947 = vmatprep.mubr.bf16.mxu0 %v656_v61 }
 0x20f   :  { %v599_v3 = vadd.f32 %v598_v2, %v1906_v36  ;;  %v600_v4 = vpop.f32.mrb[27].mxu1  ;;  %948 = vmatmul.mubr.bf16.gmra.mrb[52].mxu0 %v655_v60  ;;  %v637_v6 = vmax.f32 %v595_v63, 0.0 }
 0x210   :  { %v601_v5 = vadd.f32 %v600_v4, %v1909_v37  ;;  %v638_v8 = vmax.f32 %v597_v1, 0.0 }
 0x211   :  { %v639_v7 = vmax.f32 %v599_v3, 0.0 }
 0x212   :  { %v640_v9 = vmax.f32 %v601_v5, 0.0 }
 0x213   :  { %v657_v10 = vpack.c.bf16 %v639_v7, %v637_v6 }
 0x214   :  { %v658_v11 = vpack.c.bf16 %v640_v9, %v638_v8  ;;  %v604_v12 = vpop.f32.mrb[28].mxu1 }
 0x215   :  { %v605_v13 = vadd.f32 %v604_v12, %v1906_v36  ;;  %v606_v14 = vpop.f32.mrb[29].mxu1 }
 0x216   :  { %v607_v15 = vadd.f32 %v606_v14, %v1909_v37  ;;  %v608_v16 = vpop.f32.mrb[30].mxu1  ;;  %957 = vmatprep.mubr.bf16.mxu0 %v658_v11 }
 0x217   :  { %v609_v17 = vadd.f32 %v608_v16, %v1906_v36  ;;  %v610_v18 = vpop.f32.mrb[31].mxu1  ;;  %958 = vmatmul.mubr.bf16.gmra.mrb[56].mxu0 %v657_v10  ;;  %v641_v20 = vmax.f32 %v605_v13, 0.0  ;;  %v1580_v36 = vld [vmem:[%s2046_s7 + $0x70] sm:$0xff]  }
 0x218   :  { %v611_v19 = vadd.f32 %v610_v18, %v1909_v37  ;;  %v642_v28 = vmax.f32 %v607_v15, 0.0  ;;  %v1581_v37 = vld [vmem:[%s2046_s7 + $0x30] sm:$0xff]   ;;  %1395 = vmatprep.subr.bf16.mxu0 %v1580_v36  ;;  %1453 = vmatprep.subr.bf16.mxu1 %v1580_v36 }
 0x219   :  { %v643_v21 = vmax.f32 %v609_v17, 0.0  ;;  %1396 = vmatpush3.bf16.msra.mxu0 %v1581_v37  ;;  %1461 = vmatpush3.bf16.msra.mxu1 %v1581_v37 }
 0x21a   :  { %v644_v29 = vmax.f32 %v611_v19, 0.0  ;;  %1397 = vmatprep.subr.bf16.mxu0 %v1582_v26  ;;  %1454 = vmatprep.subr.bf16.mxu1 %v1582_v26 }
 0x21b   :  { %v659_v22 = vpack.c.bf16 %v643_v21, %v641_v20 }
 0x21c   :  { %v660_v23 = vpack.c.bf16 %v644_v29, %v642_v28 }
 0x21d   :  { %1398 = vmatpush3.bf16.msra.mxu0 %v1583_v30  ;;  %1462 = vmatpush3.bf16.msra.mxu1 %v1583_v30 }
 0x21e   :  { %967 = vmatprep.mubr.bf16.mxu0 %v660_v23 }
 0x21f   :  { %968 = vmatmul.mubr.bf16.gmra.mrb[60].mxu0 %v659_v22 }
 0x2ba   :  { %v899_v38 = vpop.f32.mrb[32].mxu0 }
 0x2bb   :  { %v900_v39 = vadd.f32 %v899_v38, %v1966_v32  ;;  %v901_v40 = vpop.f32.mrb[33].mxu0 }
 0x2bc   :  { %v902_v41 = vadd.f32 %v901_v40, %v1969_v35  ;;  %v903_v42 = vpop.f32.mrb[34].mxu0 }
 0x2bd   :  { %v904_v33 = vadd.f32 %v903_v42, %v1966_v32  ;;  %v905_v43 = vpop.f32.mrb[35].mxu0  ;;  %v978_v44 = vmax.f32 %v900_v39, 0.0 }
 0x2be   :  { %v906_v34 = vadd.f32 %v905_v43, %v1969_v35  ;;  %v979_v46 = vmax.f32 %v902_v41, 0.0 }
 0x2bf   :  { %v980_v45 = vmax.f32 %v904_v33, 0.0 }
 0x2c0   :  { %v981_v25 = vmax.f32 %v906_v34, 0.0 }
 0x2c1   :  { %v1010_v47 = vpack.c.bf16 %v980_v45, %v978_v44 }
 0x2c2   :  { %v1011_v48 = vpack.c.bf16 %v981_v25, %v979_v46  ;;  %v909_v27 = vpop.f32.mrb[36].mxu0 }
 0x2c3   :  { %v910_v49 = vadd.f32 %v909_v27, %v1966_v32  ;;  %v911_v50 = vpop.f32.mrb[37].mxu0 }
 0x2c4   :  { %v912_v51 = vadd.f32 %v911_v50, %v1969_v35  ;;  %v913_v52 = vpop.f32.mrb[38].mxu0  ;;  %1193 = vmatprep.mubr.bf16.mxu0 %v1011_v48 }
 0x2c5   :  { %v914_v53 = vadd.f32 %v913_v52, %v1966_v32  ;;  %v915_v54 = vpop.f32.mrb[39].mxu0  ;;  %1194 = vmatmul.mubr.bf16.vlgmr.msra.gmra.mrb[64].mxu0 %v1010_v47  ;;  %v982_v56 = vmax.f32 %v910_v49, 0.0 }
 0x2c6   :  { %v916_v55 = vadd.f32 %v915_v54, %v1969_v35  ;;  %v983_v58 = vmax.f32 %v912_v51, 0.0 }
 0x2c7   :  { %v984_v57 = vmax.f32 %v914_v53, 0.0 }
 0x2c8   :  { %v985_v59 = vmax.f32 %v916_v55, 0.0 }
 0x2c9   :  { %v1012_v60 = vpack.c.bf16 %v984_v57, %v982_v56 }
 0x2ca   :  { %v1013_v61 = vpack.c.bf16 %v985_v59, %v983_v58  ;;  %v919_v62 = vpop.f32.mrb[40].mxu0 }
 0x2cb   :  { %v920_v63 = vadd.f32 %v919_v62, %v1966_v32  ;;  %v921_v0 = vpop.f32.mrb[41].mxu0 }
 0x2cc   :  { %v922_v1 = vadd.f32 %v921_v0, %v1969_v35  ;;  %v923_v2 = vpop.f32.mrb[42].mxu0  ;;  %1201 = vmatprep.mubr.bf16.mxu0 %v1013_v61 }
 0x2cd   :  { %v924_v3 = vadd.f32 %v923_v2, %v1966_v32  ;;  %v925_v4 = vpop.f32.mrb[43].mxu0  ;;  %1202 = vmatmul.mubr.bf16.gmra.mrb[68].mxu0 %v1012_v60  ;;  %v986_v6 = vmax.f32 %v920_v63, 0.0 }
 0x2ce   :  { %v926_v5 = vadd.f32 %v925_v4, %v1969_v35  ;;  %v987_v8 = vmax.f32 %v922_v1, 0.0 }
 0x2cf   :  { %v988_v7 = vmax.f32 %v924_v3, 0.0 }
 0x2d0   :  { %v989_v9 = vmax.f32 %v926_v5, 0.0 }
 0x2d1   :  { %v1014_v10 = vpack.c.bf16 %v988_v7, %v986_v6 }
 0x2d2   :  { %v1015_v11 = vpack.c.bf16 %v989_v9, %v987_v8  ;;  %v929_v12 = vpop.f32.mrb[44].mxu0 }
 0x2d3   :  { %v930_v13 = vadd.f32 %v929_v12, %v1966_v32  ;;  %v931_v14 = vpop.f32.mrb[45].mxu0 }
 0x2d4   :  { %v932_v15 = vadd.f32 %v931_v14, %v1969_v35  ;;  %v933_v16 = vpop.f32.mrb[46].mxu0  ;;  %1209 = vmatprep.mubr.bf16.mxu0 %v1015_v11 }
 0x2d5   :  { %v934_v17 = vadd.f32 %v933_v16, %v1966_v32  ;;  %v935_v18 = vpop.f32.mrb[47].mxu0  ;;  %1210 = vmatmul.mubr.bf16.gmra.mrb[72].mxu0 %v1014_v10  ;;  %v990_v20 = vmax.f32 %v930_v13, 0.0 }
 0x2d6   :  { %v936_v19 = vadd.f32 %v935_v18, %v1969_v35  ;;  %v991_v28 = vmax.f32 %v932_v15, 0.0 }
 0x2d7   :  { %v992_v21 = vmax.f32 %v934_v17, 0.0 }
 0x2d8   :  { %v993_v29 = vmax.f32 %v936_v19, 0.0 }
 0x2d9   :  { %v1016_v22 = vpack.c.bf16 %v992_v21, %v990_v20  ;;  %v2006_v21 = vld [vmem:[%s2047_s8] ss:$0 sm:$0xff]  ;;  %s1661_s8 = smov [#allocation7]  }
 0x2da   :  { %v1017_v23 = vpack.c.bf16 %v993_v29, %v991_v28  ;;  %v939_v24 = vpop.f32.mrb[48].mxu0  ;;  %s1279_s16 = sshll.u32 %s1661_s8, 4  ;;  %s1280_s16 = int_to_ptr.vmem [resolvable:$true] %s1279_s16 }
 0x2db   :  { %v940_v36 = vadd.f32 %v939_v24, %v1966_v32  ;;  %v941_v37 = vpop.f32.mrb[49].mxu0  ;;  %s1628_s17 = scalar_lea.vmem %s1280_s16, 2048  ;;  %p1633_p3 = scmp.lt.s32.totalorder %s1280_s16, %s1280_s16 }
 0x2dc   :  { %v942_v26 = vadd.f32 %v941_v37, %v1969_v35  ;;  %v943_v30 = vpop.f32.mrb[50].mxu0  ;;  %1217 = vmatprep.mubr.bf16.mxu1 %v1017_v23  ;;  %p1629_p2 = scmp.ne.s32.totalorder %s1280_s16, %s1628_s17  ;;  %p1634_p4 = scmp.lt.s32.totalorder %s1628_s17, %s1628_s17 }
 0x2dd   :  { %v944_v31 = vadd.f32 %v943_v30, %v1966_v32  ;;  %v945_v38 = vpop.f32.mrb[51].mxu0  ;;  %1218 = vmatmul.mubr.bf16.vlgmr.msra.gmra.mrb[32].mxu1 %v1016_v22  ;;  %v994_v40 = vmax.f32 %v940_v36, 0.0 }
 0x2de   :  { %v946_v39 = vadd.f32 %v945_v38, %v1969_v35  ;;  %v995_v42 = vmax.f32 %v942_v26, 0.0  ;;  %p1635_p5 = por %p1634_p4, %p1633_p3 }
 0x2df   :  { %v996_v41 = vmax.f32 %v944_v31, 0.0 }
 0x2e0   :  { %v997_v33 = vmax.f32 %v946_v39, 0.0  ;;  %p1636_p6 = pnand %p1635_p5, %p1629_p2 }
 0x2e1   :  { %v1018_v43 = vpack.c.bf16 %v996_v41, %v994_v40 }
 0x2e2   :  { %v1019_v34 = vpack.c.bf16 %v997_v33, %v995_v42  ;;  %v949_v44 = vpop.f32.mrb[52].mxu0 }
 0x2e3   :  { %v950_v45 = vadd.f32 %v949_v44, %v1966_v32  ;;  %v951_v46 = vpop.f32.mrb[53].mxu0 }
 0x2e4   :  { %v952_v25 = vadd.f32 %v951_v46, %v1969_v35  ;;  %v953_v47 = vpop.f32.mrb[54].mxu0  ;;  %1225 = vmatprep.mubr.bf16.mxu1 %v1019_v34 }
 0x2e5   :  { %v954_v48 = vadd.f32 %v953_v47, %v1966_v32  ;;  %v955_v27 = vpop.f32.mrb[55].mxu0  ;;  %1226 = vmatmul.mubr.bf16.gmra.mrb[36].mxu1 %v1018_v43  ;;  %v998_v50 = vmax.f32 %v950_v45, 0.0 }
 0x2e6   :  { %v956_v49 = vadd.f32 %v955_v27, %v1969_v35  ;;  %v999_v52 = vmax.f32 %v952_v25, 0.0 }
 0x2e7   :  { %v1000_v51 = vmax.f32 %v954_v48, 0.0 }
 0x2e8   :  { %v1001_v53 = vmax.f32 %v956_v49, 0.0 }
 0x2e9   :  { %v1020_v54 = vpack.c.bf16 %v1000_v51, %v998_v50 }
 0x2ea   :  { %v1021_v55 = vpack.c.bf16 %v1001_v53, %v999_v52  ;;  %v959_v56 = vpop.f32.mrb[56].mxu0 }
 0x2eb   :  { %v960_v57 = vadd.f32 %v959_v56, %v1966_v32  ;;  %v961_v58 = vpop.f32.mrb[57].mxu0 }
 0x2ec   :  { %v962_v59 = vadd.f32 %v961_v58, %v1969_v35  ;;  %v963_v60 = vpop.f32.mrb[58].mxu0  ;;  %1233 = vmatprep.mubr.bf16.mxu1 %v1021_v55 }
 0x2ed   :  { %v964_v61 = vadd.f32 %v963_v60, %v1966_v32  ;;  %v965_v62 = vpop.f32.mrb[59].mxu0  ;;  %1234 = vmatmul.mubr.bf16.gmra.mrb[40].mxu1 %v1020_v54  ;;  %v1002_v0 = vmax.f32 %v960_v57, 0.0 }
 0x2ee   :  { %v966_v63 = vadd.f32 %v965_v62, %v1969_v35  ;;  %v1003_v2 = vmax.f32 %v962_v59, 0.0 }
 0x2ef   :  { %v1004_v1 = vmax.f32 %v964_v61, 0.0 }
 0x2f0   :  { %v1005_v3 = vmax.f32 %v966_v63, 0.0 }
 0x2f1   :  { %v1022_v4 = vpack.c.bf16 %v1004_v1, %v1002_v0 }
 0x2f2   :  { %v1023_v5 = vpack.c.bf16 %v1005_v3, %v1003_v2  ;;  %v969_v6 = vpop.f32.mrb[60].mxu0 }
 0x2f3   :  { %v970_v7 = vadd.f32 %v969_v6, %v1966_v32  ;;  %v971_v8 = vpop.f32.mrb[61].mxu0 }
 0x2f4   :  { %v972_v9 = vadd.f32 %v971_v8, %v1969_v35  ;;  %v973_v10 = vpop.f32.mrb[62].mxu0  ;;  %1241 = vmatprep.mubr.bf16.mxu1 %v1023_v5 }
 0x2f5   :  { %v974_v11 = vadd.f32 %v973_v10, %v1966_v32  ;;  %v975_v12 = vpop.f32.mrb[63].mxu0  ;;  %1242 = vmatmul.mubr.bf16.gmra.mrb[44].mxu1 %v1022_v4  ;;  %v1006_v14 = vmax.f32 %v970_v7, 0.0 }
 0x2f6   :  { %v976_v13 = vadd.f32 %v975_v12, %v1969_v35  ;;  %v1007_v16 = vmax.f32 %v972_v9, 0.0 }
 0x2f7   :  { %v1008_v15 = vmax.f32 %v974_v11, 0.0 }
 0x2f8   :  { %v1009_v17 = vmax.f32 %v976_v13, 0.0 }
 0x2f9   :  { %v1024_v18 = vpack.c.bf16 %v1008_v15, %v1006_v14 }
 0x2fa   :  { %v1025_v19 = vpack.c.bf16 %v1009_v17, %v1007_v16 }
 0x2fc   :  { %1249 = vmatprep.mubr.bf16.mxu1 %v1025_v19 }
 0x2fd   :  { %1250 = vmatmul.mubr.bf16.gmra.mrb[48].mxu1 %v1024_v18 }
 0x398   :  { %v1399_v20 = vpop.f32.mrb[64].mxu0 }
 0x399   :  { %v1400_v28 = vpop.f32.mrb[65].mxu0 }
 0x39a   :  { %v1401_v32 = vadd.f32 %v1400_v28, %v1399_v20  ;;  %v1402_v29 = vpop.f32.mrb[66].mxu0 }
 0x39b   :  { %v1403_v22 = vpop.f32.mrb[67].mxu0 }
 0x39c   :  { %v1196_v35 = vadd.f32 %v1401_v32, %v2006_v21  ;;  %v1404_v23 = vadd.f32 %v1403_v22, %v1402_v29 }
 0x39e   :  { %1258 = vst [vmem:[#allocation7] sm:$0xff] %v1196_v35  ;;  %v1199_v24 = vadd.f32 %v1404_v23, %v2006_v21 }
 0x3a0   :  { %1259 = vst [vmem:[#allocation7 + $0x8] sm:$0xff] %v1199_v24  ;;  %v1405_v36 = vpop.f32.mrb[68].mxu0 }
 0x3a1   :  { %v1406_v37 = vpop.f32.mrb[69].mxu0 }
 0x3a2   :  { %v1407_v26 = vadd.f32 %v1406_v37, %v1405_v36  ;;  %v1408_v30 = vpop.f32.mrb[70].mxu0 }
 0x3a3   :  { %v1409_v31 = vpop.f32.mrb[71].mxu0 }
 0x3a4   :  { %v1204_v38 = vadd.f32 %v1407_v26, %v2006_v21  ;;  %v1410_v39 = vadd.f32 %v1409_v31, %v1408_v30 }
 0x3a6   :  { %1260 = vst [vmem:[#allocation7 + $0x10] sm:$0xff] %v1204_v38  ;;  %v1207_v40 = vadd.f32 %v1410_v39, %v2006_v21 }
 0x3a8   :  { %1261 = vst [vmem:[#allocation7 + $0x18] sm:$0xff] %v1207_v40  ;;  %v1411_v41 = vpop.f32.mrb[72].mxu0 }
 0x3a9   :  { %v1412_v42 = vpop.f32.mrb[73].mxu0 }
 0x3aa   :  { %v1413_v33 = vadd.f32 %v1412_v42, %v1411_v41  ;;  %v1414_v43 = vpop.f32.mrb[74].mxu0 }
 0x3ab   :  { %v1415_v34 = vpop.f32.mrb[75].mxu0 }
 0x3ac   :  { %v1212_v44 = vadd.f32 %v1413_v33, %v2006_v21  ;;  %v1416_v45 = vadd.f32 %v1415_v34, %v1414_v43 }
 0x3ae   :  { %1262 = vst [vmem:[#allocation7 + $0x20] sm:$0xff] %v1212_v44  ;;  %v1215_v46 = vadd.f32 %v1416_v45, %v2006_v21 }
 0x3b0   :  { %1263 = vst [vmem:[#allocation7 + $0x28] sm:$0xff] %v1215_v46  ;;  %v1417_v25 = vpop.f32.mrb[32].mxu1 }
 0x3b1   :  { %v1418_v47 = vpop.f32.mrb[33].mxu1 }
 0x3b2   :  { %v1419_v48 = vadd.f32 %v1418_v47, %v1417_v25  ;;  %v1420_v27 = vpop.f32.mrb[34].mxu1 }
 0x3b3   :  { %v1421_v49 = vpop.f32.mrb[35].mxu1 }
 0x3b4   :  { %v1220_v50 = vadd.f32 %v1419_v48, %v2006_v21  ;;  %v1422_v51 = vadd.f32 %v1421_v49, %v1420_v27 }
 0x3b6   :  { %1264 = vst [vmem:[#allocation7 + $0x30] sm:$0xff] %v1220_v50  ;;  %v1223_v52 = vadd.f32 %v1422_v51, %v2006_v21 }
 0x3b8   :  { %1265 = vst [vmem:[#allocation7 + $0x38] sm:$0xff] %v1223_v52  ;;  %v1423_v53 = vpop.f32.mrb[36].mxu1 }
 0x3b9   :  { %v1424_v54 = vpop.f32.mrb[37].mxu1 }
 0x3ba   :  { %v1425_v55 = vadd.f32 %v1424_v54, %v1423_v53  ;;  %v1426_v56 = vpop.f32.mrb[38].mxu1 }
 0x3bb   :  { %v1427_v57 = vpop.f32.mrb[39].mxu1 }
 0x3bc   :  { %v1228_v58 = vadd.f32 %v1425_v55, %v2006_v21  ;;  %v1428_v59 = vadd.f32 %v1427_v57, %v1426_v56 }
 0x3be   :  { %1266 = vst [vmem:[#allocation7 + $0x40] sm:$0xff] %v1228_v58  ;;  %v1231_v60 = vadd.f32 %v1428_v59, %v2006_v21 }
 0x3c0   :  { %1267 = vst [vmem:[#allocation7 + $0x48] sm:$0xff] %v1231_v60  ;;  %v1429_v61 = vpop.f32.mrb[40].mxu1 }
 0x3c1   :  { %v1430_v62 = vpop.f32.mrb[41].mxu1 }
 0x3c2   :  { %v1431_v63 = vadd.f32 %v1430_v62, %v1429_v61  ;;  %v1432_v0 = vpop.f32.mrb[42].mxu1 }
 0x3c3   :  { %v1433_v1 = vpop.f32.mrb[43].mxu1 }
 0x3c4   :  { %v1236_v2 = vadd.f32 %v1431_v63, %v2006_v21  ;;  %v1434_v3 = vadd.f32 %v1433_v1, %v1432_v0 }
 0x3c6   :  { %1268 = vst [vmem:[#allocation7 + $0x50] sm:$0xff] %v1236_v2  ;;  %v1239_v4 = vadd.f32 %v1434_v3, %v2006_v21 }
 0x3c8   :  { %1269 = vst [vmem:[#allocation7 + $0x58] sm:$0xff] %v1239_v4  ;;  %v1435_v5 = vpop.f32.mrb[44].mxu1 }
 0x3c9   :  { %v1436_v6 = vpop.f32.mrb[45].mxu1 }
 0x3ca   :  { %v1437_v7 = vadd.f32 %v1436_v6, %v1435_v5  ;;  %v1438_v8 = vpop.f32.mrb[46].mxu1 }
 0x3cb   :  { %v1439_v9 = vpop.f32.mrb[47].mxu1 }
 0x3cc   :  { %v1244_v10 = vadd.f32 %v1437_v7, %v2006_v21  ;;  %v1440_v11 = vadd.f32 %v1439_v9, %v1438_v8 }
 0x3ce   :  { %1270 = vst [vmem:[#allocation7 + $0x60] sm:$0xff] %v1244_v10  ;;  %v1247_v12 = vadd.f32 %v1440_v11, %v2006_v21 }
 0x3d0   :  { %1271 = vst [vmem:[#allocation7 + $0x68] sm:$0xff] %v1247_v12  ;;  %v1441_v13 = vpop.f32.mrb[48].mxu1 }
 0x3d1   :  { %v1442_v14 = vpop.f32.mrb[49].mxu1 }
 0x3d2   :  { %v1443_v15 = vadd.f32 %v1442_v14, %v1441_v13  ;;  %v1444_v16 = vpop.f32.mrb[50].mxu1 }
 0x3d3   :  { %v1445_v17 = vpop.f32.mrb[51].mxu1 }
 0x3d4   :  { %v1252_v18 = vadd.f32 %v1443_v15, %v2006_v21  ;;  %v1446_v19 = vadd.f32 %v1445_v17, %v1444_v16 }
 0x3d6   :  { %1272 = vst [vmem:[#allocation7 + $0x70] sm:$0xff] %v1252_v18  ;;  %v1255_v20 = vadd.f32 %v1446_v19, %v2006_v21 }
 0x3d8   :  { %1273 = vst [vmem:[#allocation7 + $0x78] sm:$0xff] %v1255_v20 }
 0x3d9   :  { %1639 = shalt.err (!%p1636_p6)
}
 0x3da   :  { %s1640_s21 = scalar_lea.hbm %s2048_s9, 2048 }
 0x3db   :  { %p1641_p7 = scmp.ne.s32.totalorder %s2048_s9, %s1640_s21  ;;  %p1644_p8 = scmp.lt.u32.totalorder %s1640_s21, %s2048_s9 }
 0x3dd   :  { %p1646_p9 = pnand %p1644_p8, %p1641_p7 }
 0x3df   :  { %1649 = shalt.err (!%p1646_p9)
}
 0x3e0   :  { %1285 = dma.vmem_to_hbm [thread:$0]  %s1280_s16, 2048, %s2048_s9, [#allocation4], %s1657_s19, %s1657_s19, %s1658_s20  }
 0x3e1   :  { %1654 = dma.done.wait [#allocation4], 2048  }
 0x3e2   :  { %1655 = vsyncadd [#allocation4], 4294965248 }
 0x3e3   :  { %1289 = vsyncpa [#allocation3], 1 }
 0x3e4   :  { %1290 = vsyncpa [#allocation6], 1 }
 0x3e5   :  { %1291 = vsyncpa [#allocation4], 1 }

</bundles_post_ra>
